<compile_context>
chip_gen: v7x
topology: tpu7x:2x2x1
jax: 0.10.0
libtpu: 0.0.40
codegen_flags: <defaults>
</compile_context>

<pallas_src>
import jax
import jax.numpy as jnp
from jax.experimental import pallas as pl
from jax.experimental.pallas import tpu as pltpu


def _mish_beta_kernel(beta_ref, x_ref, o_ref):
    # beta lives in SMEM as a (1,) f32 scalar.
    beta = beta_ref[0]
    x = x_ref[...].astype(jnp.float32)
    # Numerically stable softplus: log(1 + exp(x)) = max(x, 0) + log1p(exp(-|x|)).
    sp = jnp.maximum(x, 0.0) + jnp.log1p(jnp.exp(-jnp.abs(x)))
    o_ref[...] = (x * jnp.tanh(beta * sp)).astype(o_ref.dtype)


def _round_up(v: int, m: int) -> int:
    return ((v + m - 1) // m) * m


def _tile_budget():
    """(target bytes per pipeline buffer, vmem_limit_bytes or None), per TPU gen."""
    try:
        kind = jax.devices()[0].device_kind.lower()
    except Exception:
        kind = ""
    if "v7" in kind or "tpu7" in kind:
        # 64 MiB VMEM per TC: 5 MiB tiles -> ~20 MiB live (in+out, double-buffered).
        return 5 << 20, 44 << 20
    if "v6" in kind or "tpu6" in kind:
        # 128 MiB VMEM: 8 MiB tiles -> ~32 MiB live; raise the scoped limit.
        return 8 << 20, 64 << 20
    # v5e (16 MiB scoped-VMEM default) and older/unknown chips: stay conservative.
    return 2 << 20, None


@jax.jit
def mish_beta_pallas(x: jax.Array, beta: jax.Array) -> jax.Array:
    orig_shape = x.shape
    orig_dtype = x.dtype
    n = x.size
    itemsize = jnp.dtype(orig_dtype).itemsize
    sub = max(8, 32 // itemsize)  # min sublane multiple: 8 f32 / 16 bf16 / 32 int8

    # Lane-dense 2D view.  Partial trailing row blocks are handled natively by
    # Pallas, so no padding is needed whenever n is a multiple of the lane count.
    lanes = 0
    for cand in (1024, 512, 256, 128):
        if n % cand == 0:
            lanes = cand
            break

    flat = jnp.ravel(x)  # free bitcast for a contiguous array
    if lanes:
        pad = 0
        rows = n // lanes
    else:
        # Rare path: flat length not a multiple of 128 -> minimal pad + final slice.
        lanes = 128
        rows = pl.cdiv(n, lanes)
        pad = rows * lanes - n
        flat = jnp.pad(flat, (0, pad))
    x2d = flat.reshape(rows, lanes)

    target_bytes, vmem_limit = _tile_budget()
    tile_rows = max(sub, (target_bytes // (lanes * itemsize)) // sub * sub)
    # Aim for >= ~4 grid steps when there is enough data (v7x megacore sharding +
    # pipeline overlap), never fewer than `sub` rows per tile.
    steps_cap = max(sub, _round_up(pl.cdiv(rows, 4), sub))
    tile_rows = min(tile_rows, steps_cap)
    if tile_rows >= rows:
        tile_rows = rows  # single full-extent block (always a legal block shape)

    grid = (pl.cdiv(rows, tile_rows),)  # partial trailing block is OK

    cp_kwargs = dict(dimension_semantics=("parallel",))
    if vmem_limit is not None:
        cp_kwargs["vmem_limit_bytes"] = vmem_limit

    out2d = pl.pallas_call(
        _mish_beta_kernel,
        out_shape=jax.ShapeDtypeStruct((rows, lanes), orig_dtype),
        grid_spec=pltpu.PrefetchScalarGridSpec(
            num_scalar_prefetch=0,
            grid=grid,
            in_specs=[
                pl.BlockSpec(memory_space=pltpu.MemorySpace.SMEM),   # beta scalar
                pl.BlockSpec((tile_rows, lanes), lambda i: (i, 0)),  # x tile
            ],
            out_specs=pl.BlockSpec((tile_rows, lanes), lambda i: (i, 0)),
        ),
        compiler_params=pltpu.CompilerParams(**cp_kwargs),
    )(beta.reshape(1).astype(jnp.float32), x2d)

    out_flat = out2d.reshape(-1)
    if pad:
        out_flat = out_flat[:n]
    return out_flat.reshape(orig_shape)


if __name__ == "__main__":
    key = jax.random.PRNGKey(0)
    kx, kb = jax.random.split(key)
    # NCHW input, small shapes: batch=2, channels=4, spatial=16x16.
    x = jax.random.normal(kx, (2, 4, 16, 16), dtype=jnp.float32) * 2.0
    beta = jax.random.normal(kb, (1,), dtype=jnp.float32)  # nn.Parameter(torch.randn(1))

    y = jax.block_until_ready(mish_beta_pallas(x, beta))

    # Reference: x * tanh(beta * softplus(x))  (matches the PyTorch forward)
    y_ref = x * jnp.tanh(beta * jax.nn.softplus(x))
    assert y.shape == x.shape and y.dtype == x.dtype
    assert jnp.allclose(y, y_ref, atol=1e-5, rtol=1e-5)

    print("KERNEL_OK")
</pallas_src>

<mosaic_0001>
module attributes {stable_mosaic.version = 11 : i64} {
  func.func @_mish_beta_kernel(%arg0: i32, %arg1: memref<1xf32, #tpu.memory_space<smem>>, %arg2: memref<2x1024xf32, #tpu.memory_space<vmem>>, %arg3: memref<2x1024xf32, #tpu.memory_space<vmem>>) attributes {dimension_semantics = [#tpu.dimension_semantics<parallel>], iteration_bounds = array<i64: 1>, scalar_prefetch = 0 : i64, scratch_operands = 0 : i64, tpu.core_type = #tpu.core_type<tc>, window_params = [{transform_indices = @transform_0, window_bounds = array<i64: 1>}, {transform_indices = @transform_1, window_bounds = array<i64: 2, 1024>}, {transform_indices = @transform_2, window_bounds = array<i64: 2, 1024>}]} {
    %c0 = arith.constant 0 : index
    %0 = memref.load %arg1[%c0] : memref<1xf32, #tpu.memory_space<smem>>
    %c0_0 = arith.constant 0 : index
    %c0_1 = arith.constant 0 : index
    %1 = vector.load %arg2[%c0_0, %c0_1] : memref<2x1024xf32, #tpu.memory_space<vmem>>, vector<2x1024xf32>
    %cst = arith.constant 0.000000e+00 : f32
    %2 = vector.broadcast %cst : f32 to vector<2x1024xf32>
    %3 = arith.maximumf %1, %2 : vector<2x1024xf32>
    %4 = math.absf %1 : vector<2x1024xf32>
    %cst_2 = arith.constant 0.000000e+00 : f32
    %5 = vector.broadcast %cst_2 : f32 to vector<2x1024xf32>
    %6 = arith.subf %5, %4 : vector<2x1024xf32>
    %7 = math.exp %6 : vector<2x1024xf32>
    %8 = math.log1p %7 : vector<2x1024xf32>
    %9 = arith.addf %3, %8 : vector<2x1024xf32>
    %10 = vector.broadcast %0 : f32 to vector<2x1024xf32>
    %11 = arith.mulf %10, %9 : vector<2x1024xf32>
    %12 = math.tanh %11 : vector<2x1024xf32>
    %13 = arith.mulf %1, %12 : vector<2x1024xf32>
    %c0_3 = arith.constant 0 : index
    %c0_4 = arith.constant 0 : index
    %14 = vector.load %arg3[%c0_3, %c0_4] : memref<2x1024xf32, #tpu.memory_space<vmem>>, vector<2x1024xf32>
    tpu.vector_store %arg3[%c0_3, %c0_4], %13 {strides = array<i32>} : memref<2x1024xf32, #tpu.memory_space<vmem>>, vector<2x1024xf32>,
    return
  }
  func.func @transform_0(%arg0: i32) -> i32 {
    %c0_i32 = arith.constant 0 : i32
    %c0_i32_0 = arith.constant 0 : i32
    return %c0_i32 : i32
  }
  func.func @transform_1(%arg0: i32) -> (i32, i32) {
    %c0_i32 = arith.constant 0 : i32
    %c0_i32_0 = arith.constant 0 : i32
    return %arg0, %c0_i32 : i32, i32
  }
  func.func @transform_2(%arg0: i32) -> (i32, i32) {
    %c0_i32 = arith.constant 0 : i32
    %c0_i32_0 = arith.constant 0 : i32
    return %arg0, %c0_i32 : i32, i32
  }
}

</mosaic_0001>

<bundles_post_ra>
// kernel: mish_beta_pallas.1
= control target key start
LH: loop header
LB: loop body
LE: loop exit
PB: predicated region body
PF: predicated region fallthrough
CT: control target
= control target key end

     0   :  { %s100_s1 = inlined_call_operand.vmem [shape: f32[2,1024], index: 1, kind: input, shape index: {}]   ;;  %s101_s0 = inlined_call_operand.<no memory space> [shape: f32[1], index: 0, kind: input, shape index: {}]   ;;  %s102_s2 = inlined_call_operand.vmem [shape: f32[2,1024], index: 2, kind: output, shape index: {}]  }
   0x1   :  { %v13_v0 = vld [vmem:[%s100_s1] sm:$0xff]  ;;  %v14_v1 = vld [vmem:[%s100_s1 + $0x8] sm:$0xff]  ;;  %v45_v27 = vstv %s101_s0 }
   0x2   :  { %v17_v2 = vand.u32 2147483647, %v13_v0  ;;  %v18_v3 = vand.u32 2147483647, %v14_v1  ;;  %v15_v20 = vmax.f32 %v13_v0, 0.0  ;;  %v16_v24 = vmax.f32 %v14_v1, 0.0 }
   0x4   :  { %v19_v4 = vsub.f32 0.0, %v17_v2  ;;  %v20_v5 = vsub.f32 0.0, %v18_v3 }
   0x6   :  { %v21_v6 = vmul.f32 1.442695, %v19_v4  ;;  %v23_v7 = vmul.f32 1.442695, %v20_v5 }
   0x8   :  { %58 = vpow2.f32 %v21_v6 }
   0x9   :  { %60 = vpow2.f32 %v23_v7 }
  0x12   :  { %v59_v8 = vpop.eup %58 }
  0x13   :  { %v61_v9 = vpop.eup %60  ;;  %v25_v10 = vadd.f32 1.0, %v59_v8  ;;  %v28_v12 = vmul.f32 -0.5, %v59_v8  ;;  %v31_v15 = vand.u32 2147483647, %v59_v8 }
  0x14   :  { %v34_v11 = vadd.f32 1.0, %v61_v9  ;;  %v37_v13 = vmul.f32 -0.5, %v61_v9  ;;  %v40_v17 = vand.u32 2147483647, %v61_v9 }
  0x15   :  { %62 = vlog2.f32 %v25_v10  ;;  %v29_v14 = vadd.f32 1.0, %v28_v12  ;;  %vm32_vm0 = vcmp.lt.f32.partialorder %v31_v15, 0.0004427343 }
  0x16   :  { %64 = vlog2.f32 %v34_v11  ;;  %v38_v16 = vadd.f32 1.0, %v37_v13  ;;  %vm41_vm1 = vcmp.lt.f32.partialorder %v40_v17, 0.0004427343 }
  0x17   :  { %v30_v18 = vmul.f32 %v59_v8, %v29_v14 }
  0x18   :  { %v39_v21 = vmul.f32 %v61_v9, %v38_v16 }
  0x1f   :  { %v63_v19 = vpop.eup %62 }
  0x20   :  { %v65_v22 = vpop.eup %64  ;;  %v27_v23 = vmul.f32 0.6931472, %v63_v19 }
  0x21   :  { %v36_v25 = vmul.f32 0.6931472, %v65_v22 }
  0x22   :  { %v33_v26 = vsel %vm32_vm0, %v30_v18, %v27_v23 }
  0x23   :  { %v43_v28 = vadd.f32 %v33_v26, %v15_v20  ;;  %v42_v29 = vsel %vm41_vm1, %v39_v21, %v36_v25 }
  0x24   :  { %v44_v30 = vadd.f32 %v42_v29, %v16_v24 }
  0x25   :  { %v46_v31 = vmul.f32 %v45_v27, %v43_v28 }
  0x26   :  { %v47_v32 = vmul.f32 %v45_v27, %v44_v30 }
  0x27   :  { %66 = vtanh.f32 %v46_v31 }
  0x28   :  { %68 = vtanh.f32 %v47_v32 }
  0x31   :  { %v67_v33 = vpop.eup %66 }
  0x32   :  { %v69_v34 = vpop.eup %68  ;;  %v50_v35 = vmul.f32 %v67_v33, %v13_v0 }
  0x33   :  { %v51_v36 = vmul.f32 %v69_v34, %v14_v1 }
  0x34   :  { %52 = vst [vmem:[%s102_s2] sm:$0xff] %v50_v35 }
  0x35   :  { %53 = vst [vmem:[%s102_s2 + $0x8] sm:$0xff] %v51_v36 }

</bundles_post_ra>
